<compile_context>
chip_gen: v7x
topology: tpu7x:2x2x1
jax: 0.10.0
libtpu: 0.0.40
codegen_flags: <defaults>
</compile_context>

<pallas_src>
import jax
import jax.numpy as jnp
from jax import lax
from jax.experimental import pallas as pl
from jax.experimental.pallas import tpu as pltpu

EMBED = 16
LANE = 128  # TPU vreg lane width; vocab axis is padded to a multiple of this.


def sentiment_kernel(ids_ref, fused_ref, b_ref, out_ref):
    """ids_ref: [B, T] int32 (VMEM); fused_ref: [1, Vp] f32 (VMEM, = (emb @ w).T / T,
    zero-padded to Vp lanes); b_ref: [1] f32 (SMEM scalar); out_ref: [B, 1] f32."""
    ids = ids_ref[...]                       # [B, T] int32
    B, T = ids.shape
    Vp = fused_ref.shape[1]                  # lane-padded vocab (multiple of 128)

    # Integer one-hot token counts: counts[b, v] = #{t : ids[b, t] == v}.
    # Compare + sum stay in int32 on the VPU; only the [B, Vp] result is cast.
    vocab_iota = lax.broadcasted_iota(jnp.int32, (B, T, Vp), 2)
    counts = jnp.sum((vocab_iota == ids[:, :, None]).astype(jnp.int32), axis=1)
    counts_f = counts.astype(jnp.float32)    # [B, Vp]

    # mean_t emb[ids[t]] @ w  ==  (counts / T) @ (emb @ w); the 1/T factor is
    # already folded into fused_ref by the wrapper. With an output feature dim
    # of 1, a VPU multiply + cross-lane (XLU) reduce beats an MXU matmul.
    logits = jnp.sum(counts_f * fused_ref[...], axis=-1, keepdims=True) + b_ref[0]

    # Sigmoid (EUP) + round-half-even to 4 decimals (matches torch.round(x, 4)).
    p = jax.nn.sigmoid(logits)
    out_ref[...] = jnp.round(p * 1e4) / 1e4


def sentiment_forward(ids, embed_table, w, b):
    """ids: [B, T] int32, embed_table: [V, 16] f32, w: [16, 1] f32, b: [1] f32."""
    B, T = ids.shape
    V, _ = embed_table.shape
    Vp = ((V + LANE - 1) // LANE) * LANE

    # Fold Linear(16 -> 1) and the 1/T mean into a single [1, Vp] row vector
    # (constant w.r.t. the token ids); zero-pad the vocab axis to full lanes so
    # padded vocab slots contribute exactly 0.
    fused = jnp.dot(embed_table, w, preferred_element_type=jnp.float32) / T  # [V, 1]
    fused = fused.reshape(1, V)                                              # [1, V]
    fused = jnp.pad(fused, ((0, 0), (0, Vp - V)))                            # [1, Vp]

    vmem = pl.BlockSpec(memory_space=pltpu.MemorySpace.VMEM)
    smem = pl.BlockSpec(memory_space=pltpu.MemorySpace.SMEM)
    return pl.pallas_call(
        sentiment_kernel,
        out_shape=jax.ShapeDtypeStruct((B, 1), jnp.float32),
        in_specs=[vmem, vmem, smem],
        out_specs=vmem,
    )(ids, fused, b)


def reference_forward(ids, embed_table, w, b):
    """Pure-JAX reference matching the PyTorch forward exactly (gather order)."""
    emb = jnp.take(embed_table, ids, axis=0)        # [B, T, D]
    mean_emb = jnp.mean(emb, axis=1)                # [B, D]
    logits = mean_emb @ w + b[None, :]              # [B, 1]
    p = jax.nn.sigmoid(logits)
    return jnp.round(p * 1e4) / 1e4


if __name__ == "__main__":
    VOCAB = 64     # vocabulary_size
    B, T = 2, 8    # small batch / sequence

    key = jax.random.PRNGKey(0)
    k_ids, k_emb, k_w, k_b = jax.random.split(key, 4)

    # Deterministic synthetic parameters (shapes from the module's __init__).
    embed_table = jax.random.normal(k_emb, (VOCAB, EMBED), dtype=jnp.float32)
    # nn.Linear(16, 1): weight [1, 16] stored transposed as [16, 1]; bias [1].
    w = (jax.random.uniform(k_w, (EMBED, 1), dtype=jnp.float32) - 0.5) * 0.5
    b = (jax.random.uniform(k_b, (1,), dtype=jnp.float32) - 0.5) * 0.5

    ids = jax.random.randint(k_ids, (B, T), 0, VOCAB, dtype=jnp.int32)

    out = jax.block_until_ready(sentiment_forward(ids, embed_table, w, b))
    ref = reference_forward(ids, embed_table, w, b)

    assert out.shape == (B, 1) and out.dtype == jnp.float32
    # Both outputs are rounded to 4 decimals. The fused summation order can, in
    # pathological boundary cases, shift a value across a 0.00005 rounding
    # boundary, so allow at most one rounding quantum.
    assert jnp.max(jnp.abs(out - ref)) <= 1e-4 + 1e-6, (out, ref)

    print("KERNEL_OK")
</pallas_src>

<mosaic_0001>
module attributes {stable_mosaic.version = 11 : i64} {
  func.func @sentiment_kernel(%arg0: memref<2x8xi32, #tpu.memory_space<vmem>>, %arg1: memref<1x128xf32, #tpu.memory_space<vmem>>, %arg2: memref<1xf32, #tpu.memory_space<smem>>, %arg3: memref<2x1xf32, #tpu.memory_space<vmem>>) attributes {dimension_semantics = [], scalar_prefetch = 0 : i64, scratch_operands = 0 : i64, tpu.core_type = #tpu.core_type<tc>} {
    %c0 = arith.constant 0 : index
    %c0_0 = arith.constant 0 : index
    %0 = vector.load %arg0[%c0, %c0_0] : memref<2x8xi32, #tpu.memory_space<vmem>>, vector<2x8xi32>
    %1 = tpu.iota {dimensions = array<i32: 2>} : vector<2x8x128xi32>
    %2 = vector.shape_cast %0 : vector<2x8xi32> to vector<2x8x1xi32>
    %3 = vector.broadcast %2 : vector<2x8x1xi32> to vector<2x8x128xi32>
    %4 = arith.cmpi eq, %1, %3 : vector<2x8x128xi32>
    %5 = arith.extui %4 : vector<2x8x128xi1> to vector<2x8x128xi32>
    %cst = arith.constant dense<0> : vector<2x128xi32>
    %6 = vector.multi_reduction <add>, %5, %cst [1] : vector<2x8x128xi32> to vector<2x128xi32>
    %7 = arith.sitofp %6 : vector<2x128xi32> to vector<2x128xf32>
    %c0_1 = arith.constant 0 : index
    %c0_2 = arith.constant 0 : index
    %8 = vector.load %arg1[%c0_1, %c0_2] : memref<1x128xf32, #tpu.memory_space<vmem>>, vector<1x128xf32>
    %9 = vector.broadcast %8 : vector<1x128xf32> to vector<2x128xf32>
    %10 = arith.mulf %7, %9 : vector<2x128xf32>
    %cst_3 = arith.constant dense<0.000000e+00> : vector<2xf32>
    %11 = vector.multi_reduction <add>, %10, %cst_3 [1] : vector<2x128xf32> to vector<2xf32>
    %12 = vector.shape_cast %11 : vector<2xf32> to vector<2x1xf32>
    %c0_4 = arith.constant 0 : index
    %13 = memref.load %arg2[%c0_4] : memref<1xf32, #tpu.memory_space<smem>>
    %14 = vector.broadcast %13 : f32 to vector<2x1xf32>
    %15 = arith.addf %12, %14 : vector<2x1xf32>
    %16 = arith.negf %15 : vector<2x1xf32>
    %17 = math.exp %16 : vector<2x1xf32>
    %cst_5 = arith.constant 1.000000e+00 : f32
    %18 = vector.broadcast %cst_5 : f32 to vector<2x1xf32>
    %19 = arith.addf %18, %17 : vector<2x1xf32>
    %20 = arith.divf %18, %19 : vector<2x1xf32>
    %cst_6 = arith.constant 1.000000e+04 : f32
    %21 = vector.broadcast %cst_6 : f32 to vector<2x1xf32>
    %22 = arith.mulf %20, %21 : vector<2x1xf32>
    %23 = math.roundeven %22 : vector<2x1xf32>
    %cst_7 = arith.constant 1.000000e+04 : f32
    %24 = vector.broadcast %cst_7 : f32 to vector<2x1xf32>
    %25 = arith.divf %23, %24 : vector<2x1xf32>
    %c0_8 = arith.constant 0 : index
    %c0_9 = arith.constant 0 : index
    %26 = vector.load %arg3[%c0_8, %c0_9] : memref<2x1xf32, #tpu.memory_space<vmem>>, vector<2x1xf32>
    tpu.vector_store %arg3[%c0_8, %c0_9], %25 {strides = array<i32>} : memref<2x1xf32, #tpu.memory_space<vmem>>, vector<2x1xf32>,
    return
  }
}

</mosaic_0001>

<bundles_post_ra>
// kernel: tpu_custom_call.1
= control target key start
LH: loop header
LB: loop body
LE: loop exit
PB: predicated region body
PF: predicated region fallthrough
CT: control target
= control target key end

     0   :  { %v16_v0 = vlaneseq  ;;  %v96_v9 = vmov 0   ;;  %vm62_vm2 = vcmask 1041409   ;;  %vm65_vm3 = vcmask 1041408   ;;  %s129_s0 = inlined_call_operand.vmem [shape: s32[2,8], index: 0, kind: input, shape index: {}]   ;;  %s130_s1 = inlined_call_operand.vmem [shape: f32[1,128], index: 1, kind: input, shape index: {}]   ;;  %s131_s2 = inlined_call_operand.<no memory space> [shape: f32[1], index: 2, kind: input, shape index: {}]   ;;  %s132_s3 = inlined_call_operand.vmem [shape: f32[2,1], index: 3, kind: output, shape index: {}]  }
   0x1   :  { %v15_v2 = vld [vmem:[%s129_s0] sm:$0x3]  ;;  %v70_v33 = vstv %s131_s2  ;;  %vm82_vm4 = vcmask 1024  }
   0x2   :  { %v19_v1 = vshrl.u32 %v16_v0, 7  ;;  %v17_v7 = vand.u32 127, %v16_v0  ;;  %v88_v23 = vld [vmem:[%s130_s1] ss:$0 sm:$0xff] }
   0x4   :  { %v27_v3 = vsub.s32 1, %v19_v1  ;;  %v20_v4 = vsub.s32 0, %v19_v1 }
   0x6   :  { %v28_v5 = vrot.slane %v15_v2, %v27_v3  ;;  %v21_v6 = vrot.slane %v15_v2, %v20_v4 }
   0x8   :  { %30 = vbcast.lane.b32.xlu0 %v28_v5, 256 }
   0xc   :  { %23 = vbcast.lane.b32.xlu0 %v21_v6, 256 }
  0x7a   :  { %v31_v8 = vpop.permute.xlu0 %30 }
  0x7b   :  { %vm33_vm0 = vcmp.eq.s32.totalorder %v17_v7, %v31_v8 }
  0x7c   :  { %v35_v10 = vsel %vm33_vm0, 1, %v96_v9 }
  0x7d   :  { %v42_v11 = vrot.slane %v35_v10, 4 }
  0x7e   :  { %v24_v12 = vpop.permute.xlu0 %23 }
  0x7f   :  { %v43_v13 = vadd.s32 %v42_v11, %v35_v10  ;;  %vm32_vm1 = vcmp.eq.s32.totalorder %v17_v7, %v24_v12 }
  0x80   :  { %v34_v14 = vsel %vm32_vm1, 1, %v96_v9 }
  0x81   :  { %v44_v15 = vrot.slane %v43_v13, 2  ;;  %v36_v16 = vrot.slane %v34_v14, 4 }
  0x83   :  { %v45_v17 = vadd.s32 %v44_v15, %v43_v13  ;;  %v37_v18 = vadd.s32 %v36_v16, %v34_v14 }
  0x85   :  { %v46_v19 = vrot.slane %v45_v17, 1  ;;  %v38_v20 = vrot.slane %v37_v18, 2 }
  0x87   :  { %v47_v21 = vadd.s32 %v46_v19, %v45_v17  ;;  %v39_v22 = vadd.s32 %v38_v20, %v37_v18 }
  0x89   :  { %v49_v24 = vcvt.s32.f32 %v47_v21  ;;  %v40_v25 = vrot.slane %v39_v22, 1 }
  0x8b   :  { %v41_v26 = vadd.s32 %v40_v25, %v39_v22  ;;  %v58_v27 = vmul.f32 %v88_v23, %v49_v24 }
  0x8d   :  { %v48_v28 = vcvt.s32.f32 %v41_v26  ;;  %v61_v30 = vrot.slane %v58_v27, 7 }
  0x8f   :  { %v57_v29 = vmul.f32 %v88_v23, %v48_v28 }
  0x91   :  { %v63_v31 = vsel %vm62_vm2, %v61_v30, %v57_v29 }
  0x92   :  { %v66_v32 = vsel %vm65_vm3, %v63_v31, 0.0 }
  0x93   :  { %67 = vadd.xlane.f32.xlu1 %v66_v32 }
 0x120   :  { %v68_v34 = vpop.xlane.xlu1 %67 }
 0x121   :  { %v71_v35 = vadd.f32 %v70_v33, %v68_v34 }
 0x123   :  { %v89_v36 = vmul.f32 -1.442695, %v71_v35 }
 0x125   :  { %92 = vpow2.f32 %v89_v36 }
 0x12f   :  { %v93_v37 = vpop.eup %92 }
 0x130   :  { %v75_v38 = vadd.f32 1.0, %v93_v37 }
 0x132   :  { %94 = vrcp.f32 %v75_v38 }
 0x13c   :  { %v95_v39 = vpop.eup %94 }
 0x13d   :  { %v78_v40 = vmul.f32 10000.0, %v95_v39 }
 0x13f   :  { %v90_v41 = vround.rtne.f32 %v78_v40 }
 0x141   :  { %v81_v42 = vmul.f32 0.0001, %v90_v41 }
 0x143   :  { %83 = vst.msk [vmem:[%s132_s3] sm:$0x3] %vm82_vm4, %v81_v42 }

</bundles_post_ra>
